<compile_context>
chip_gen: v7x
topology: tpu7x:2x2x1
jax: 0.10.0
libtpu: 0.0.40
codegen_flags: <defaults>
</compile_context>

<pallas_src>
import math

import jax
import jax.numpy as jnp
from jax.experimental import pallas as pl
from jax.experimental.pallas import tpu as pltpu

_NCOMP = 3               # G3 vector components per group
_LANES = 128             # TPU lane width
_ROW = _NCOMP * _LANES   # 384: whole component-groups per lane-dense row


def _mean_vsilu_kernel(x_ref, o_ref):
    x = x_ref[...]
    xf = x.astype(jnp.float32)
    L = x_ref.shape[-1]                      # static row width (multiple of 3)

    # Component index of each lane within its group of 3 (groups never straddle
    # a row: L % 3 == 0 and each row starts at a flat index that is a multiple
    # of 3).  Position 1 is the "middle" component of every group.
    lane = jax.lax.broadcasted_iota(jnp.int32, xf.shape, dimension=1)
    is_mid = (lane % _NCOMP) == 1

    # x[i-1] + x[i+1]; using shifts {1, L-1} makes this independent of the
    # rotate-direction convention of pltpu.roll (both are non-negative too).
    nbr = pltpu.roll(xf, 1, axis=1) + pltpu.roll(xf, L - 1, axis=1)

    # Full group sum -> gate, valid at the middle component of every group.
    # Multiply by a constant reciprocal instead of dividing.
    gate_mid = jax.nn.sigmoid((xf + nbr) * (1.0 / _NCOMP))

    # Broadcast each middle's gate to its two edge components: every edge lane
    # has exactly one middle lane at distance 1 (its other distance-1 neighbour
    # is an edge whose masked gate is 0), so the symmetric roll-sum recovers it.
    gm = jnp.where(is_mid, gate_mid, 0.0)
    gate_edge = pltpu.roll(gm, 1, axis=1) + pltpu.roll(gm, L - 1, axis=1)

    gate = jnp.where(is_mid, gate_mid, gate_edge)
    o_ref[...] = (gate * xf).astype(o_ref.dtype)


def clifford_g3_mean_vsilu(x, *, block_rows=1024):
    """sigmoid(mean(x, -1, keepdims=True)) * x for G3 vectors (last dim == 3)."""
    orig_shape = x.shape
    if orig_shape[-1] != _NCOMP:
        raise ValueError(f"expected last dim == {_NCOMP}, got {orig_shape[-1]}")

    n = math.prod(orig_shape)
    flat = x.reshape(n)                      # free reshape (contiguous layout)

    pad = (-n) % _ROW
    if pad:
        # Rare path (prod(leading dims) % 128 != 0): zero-pad the flat tail.
        # Padded groups gate to sigmoid(0) * 0 == 0 and are sliced off below.
        flat = jnp.pad(flat, (0, pad))
    n_pad = n + pad
    rows = n_pad // _ROW

    tr = min(block_rows, rows)
    if tr < rows:
        tr = max(8, (tr // 8) * 8)           # sublane-aligned tile rows

    x2 = flat.reshape(rows, _ROW)            # free reshape

    out = pl.pallas_call(
        _mean_vsilu_kernel,
        out_shape=jax.ShapeDtypeStruct((rows, _ROW), x.dtype),
        grid_spec=pl.GridSpec(
            grid=(pl.cdiv(rows, tr),),       # ragged last block handled by masking
            in_specs=[pl.BlockSpec((tr, _ROW), lambda i: (i, 0))],
            out_specs=pl.BlockSpec((tr, _ROW), lambda i: (i, 0)),
        ),
        compiler_params=pltpu.CompilerParams(
            dimension_semantics=("parallel",),   # shard row-blocks across TCs (v7x)
        ),
    )(x2)

    out = out.reshape(n_pad)
    if pad:
        out = out[:n]
    return out.reshape(orig_shape)


if __name__ == "__main__":
    key = jax.random.PRNGKey(0)
    # Small G3 vector field: batch=2, channels=4, spatial=16x16, 3 vector comps.
    B, C, H, W, I = 2, 4, 16, 16, 3
    x = jax.random.normal(key, (B, C, H, W, I), dtype=jnp.float32)

    y = clifford_g3_mean_vsilu(x)
    y = jax.block_until_ready(y)

    # Reference (plain JAX) check of the PyTorch semantics.
    ref = jax.nn.sigmoid(jnp.mean(x, axis=-1, keepdims=True)) * x
    assert y.shape == x.shape and y.dtype == x.dtype
    assert jnp.allclose(y, ref, atol=1e-5, rtol=1e-5)

    print("KERNEL_OK")
</pallas_src>

<mosaic_0001>
module attributes {stable_mosaic.version = 11 : i64} {
  func.func @_mean_vsilu_kernel(%arg0: i32, %arg1: memref<16x384xf32, #tpu.memory_space<vmem>>, %arg2: memref<16x384xf32, #tpu.memory_space<vmem>>) attributes {dimension_semantics = [#tpu.dimension_semantics<parallel>], iteration_bounds = array<i64: 1>, scalar_prefetch = 0 : i64, scratch_operands = 0 : i64, tpu.core_type = #tpu.core_type<tc>, window_params = [{transform_indices = @transform_0, window_bounds = array<i64: 16, 384>}, {transform_indices = @transform_1, window_bounds = array<i64: 16, 384>}]} {
    %c0 = arith.constant 0 : index
    %c0_0 = arith.constant 0 : index
    %0 = vector.load %arg1[%c0, %c0_0] : memref<16x384xf32, #tpu.memory_space<vmem>>, vector<16x384xf32>
    %1 = tpu.iota {dimensions = array<i32: 1>} : vector<16x384xi32>
    %c3_i32 = arith.constant 3 : i32
    %c0_i32 = arith.constant 0 : i32
    %2 = arith.cmpi eq, %c3_i32, %c0_i32 : i32
    %c1_i32 = arith.constant 1 : i32
    %3 = arith.select %2, %c1_i32, %c3_i32 : i32
    %4 = vector.broadcast %3 : i32 to vector<16x384xi32>
    %5 = arith.remsi %1, %4 : vector<16x384xi32>
    %c0_i32_1 = arith.constant 0 : i32
    %6 = vector.broadcast %c0_i32_1 : i32 to vector<16x384xi32>
    %7 = arith.cmpi ne, %5, %6 : vector<16x384xi32>
    %c0_i32_2 = arith.constant 0 : i32
    %8 = vector.broadcast %c0_i32_2 : i32 to vector<16x384xi32>
    %9 = arith.cmpi slt, %5, %8 : vector<16x384xi32>
    %c0_i32_3 = arith.constant 0 : i32
    %10 = arith.cmpi slt, %3, %c0_i32_3 : i32
    %11 = vector.broadcast %10 : i1 to vector<16x384xi1>
    %12 = vector.broadcast %11 : vector<16x384xi1> to vector<16x384xi1>
    %13 = arith.xori %9, %12 : vector<16x384xi1>
    %14 = arith.andi %13, %7 : vector<16x384xi1>
    %15 = vector.broadcast %3 : i32 to vector<16x384xi32>
    %16 = arith.addi %5, %15 : vector<16x384xi32>
    %17 = arith.select %14, %16, %5 : vector<16x384xi1>, vector<16x384xi32>
    %c1_i32_4 = arith.constant 1 : i32
    %18 = vector.broadcast %c1_i32_4 : i32 to vector<16x384xi32>
    %19 = arith.cmpi eq, %17, %18 : vector<16x384xi32>
    %c1_i32_5 = arith.constant 1 : i32
    %20 = tpu.dynamic_rotate %0 by %c1_i32_5 dim 1 : vector<16x384xf32>, i32 -> vector<16x384xf32>
    %c383_i32 = arith.constant 383 : i32
    %21 = tpu.dynamic_rotate %0 by %c383_i32 dim 1 : vector<16x384xf32>, i32 -> vector<16x384xf32>
    %22 = arith.addf %20, %21 : vector<16x384xf32>
    %23 = arith.addf %0, %22 : vector<16x384xf32>
    %cst = arith.constant 0.333333343 : f32
    %24 = vector.broadcast %cst : f32 to vector<16x384xf32>
    %25 = arith.mulf %23, %24 : vector<16x384xf32>
    %26 = arith.negf %25 : vector<16x384xf32>
    %27 = math.exp %26 : vector<16x384xf32>
    %cst_6 = arith.constant 1.000000e+00 : f32
    %28 = vector.broadcast %cst_6 : f32 to vector<16x384xf32>
    %29 = arith.addf %28, %27 : vector<16x384xf32>
    %30 = arith.divf %28, %29 : vector<16x384xf32>
    %cst_7 = arith.constant 0.000000e+00 : f32
    %31 = vector.broadcast %cst_7 : f32 to vector<16x384xf32>
    %32 = arith.select %19, %30, %31 : vector<16x384xi1>, vector<16x384xf32>
    %c1_i32_8 = arith.constant 1 : i32
    %33 = tpu.dynamic_rotate %32 by %c1_i32_8 dim 1 : vector<16x384xf32>, i32 -> vector<16x384xf32>
    %c383_i32_9 = arith.constant 383 : i32
    %34 = tpu.dynamic_rotate %32 by %c383_i32_9 dim 1 : vector<16x384xf32>, i32 -> vector<16x384xf32>
    %35 = arith.addf %33, %34 : vector<16x384xf32>
    %36 = arith.select %19, %30, %35 : vector<16x384xi1>, vector<16x384xf32>
    %37 = arith.mulf %36, %0 : vector<16x384xf32>
    %c0_10 = arith.constant 0 : index
    %c0_11 = arith.constant 0 : index
    %38 = vector.load %arg2[%c0_10, %c0_11] : memref<16x384xf32, #tpu.memory_space<vmem>>, vector<16x384xf32>
    tpu.vector_store %arg2[%c0_10, %c0_11], %37 {strides = array<i32>} : memref<16x384xf32, #tpu.memory_space<vmem>>, vector<16x384xf32>,
    return
  }
  func.func @transform_0(%arg0: i32) -> (i32, i32) {
    %c0_i32 = arith.constant 0 : i32
    %c0_i32_0 = arith.constant 0 : i32
    return %arg0, %c0_i32 : i32, i32
  }
  func.func @transform_1(%arg0: i32) -> (i32, i32) {
    %c0_i32 = arith.constant 0 : i32
    %c0_i32_0 = arith.constant 0 : i32
    return %arg0, %c0_i32 : i32, i32
  }
}

</mosaic_0001>

<bundles_post_ra>
// kernel: tpu_custom_call.1
= control target key start
LH: loop header
LB: loop body
LE: loop exit
PB: predicated region body
PF: predicated region fallthrough
CT: control target
= control target key end

     0   :  { %6 = vsyncpa [#allocation3], 0  ;;  %s577_s0 = inlined_call_operand.hbm [shape: f32[16,384], index: 0, kind: input, shape index: {}]   ;;  %s578_s1 = inlined_call_operand.hbm [shape: f32[16,384], index: 1, kind: output, shape index: {}]  }
   0x1   :  { %7 = vsyncpa [#allocation4], 0  ;;  %s349_s6 = smov [#allocation2]   ;;  %s301_s10 = scalar_lea.hbm %s577_s0, 768 }
   0x2   :  { %s13_s7 = sshll.u32 %s349_s6, 4  ;;  %p302_p0 = scmp.ne.s32.totalorder %s577_s0, %s301_s10  ;;  %s14_s7 = int_to_ptr.vmem [resolvable:$true] %s13_s7 }
   0x3   :  { %p305_p1 = scmp.lt.u32.totalorder %s301_s10, %s577_s0 }
   0x5   :  { %p307_p2 = pnand %p305_p1, %p302_p0 }
   0x7   :  { %310 = shalt.err (!%p307_p2)
}
   0x8   :  { %s311_s15 = scalar_lea.vmem %s14_s7, 768  ;;  %p316_p4 = scmp.lt.s32.totalorder %s14_s7, %s14_s7 }
   0x9   :  { %p312_p3 = scmp.ne.s32.totalorder %s14_s7, %s311_s15  ;;  %p317_p5 = scmp.lt.s32.totalorder %s311_s15, %s311_s15 }
   0xb   :  { %p318_p6 = por %p317_p5, %p316_p4 }
   0xd   :  { %p319_p7 = pnand %p318_p6, %p312_p3 }
   0xf   :  { %322 = shalt.err (!%p319_p7)
}
  0x10   :  { %s350_s16 = smov 384   ;;  %s351_s17 = smov 24  }
  0x11   :  { %19 = dma.hbm_to_vmem [thread:$0]  %s577_s0, 768, %s14_s7, [#allocation3], %s350_s16, %s350_s16, %s351_s17  }
  0x12   :  { %345 = dma.done.wait [#allocation3], 768  }
  0x13   :  { %346 = vsyncadd [#allocation3], 4294966528  ;;  %v380_v0 = vld [vmem:[#allocation2 + $0x8] sm:$0xff]  ;;  %v382_v1 = vld [vmem:[#allocation2] sm:$0xff]  ;;  %s352_s20 = smov 1   ;;  %s353_s0 = smov 127   ;;  %v29_v10 = vlaneseq }
  0x14   :  { %88 = vrot.lane.b32.xlu1 %v380_v0, %s352_s20  ;;  %84 = vrot.lane.b32.xlu0 %v382_v1, %s352_s20  ;;  %v388_v2 = vld [vmem:[#allocation2 + $0x20] sm:$0xff]  ;;  %v390_v3 = vld [vmem:[#allocation2 + $0x18] sm:$0xff]  ;;  %v396_v4 = vld [vmem:[#allocation2 + $0x28] sm:$0xff]  ;;  %s354_s21 = smov [#allocation5]  }
  0x15   :  { %v398_v5 = vld [vmem:[#allocation2 + $0x10] sm:$0xff]  ;;  %v416_v13 = vand.u32 127, %v29_v10  ;;  %s247_s22 = sshll.u32 %s354_s21, 4  ;;  %s248_s22 = int_to_ptr.vmem [resolvable:$true] %s247_s22 }
  0x16   :  { %s323_s23 = scalar_lea.vmem %s248_s22, 768  ;;  %p328_p9 = scmp.lt.s32.totalorder %s248_s22, %s248_s22 }
  0x17   :  { %vm115_vm0 = vcmp.lt.s32.totalorder %v416_v13, 127  ;;  %v420_v16 = vmul.u32.u64.low 2863311531, %v416_v13  ;;  %v421_v17 = vmul.u32.u64.high 2863311531, %v416_v13, %v420_v16  ;;  %v424_v18 = vadd.s32 128, %v416_v13  ;;  %p324_p8 = scmp.ne.s32.totalorder %s248_s22, %s323_s23  ;;  %p329_p10 = scmp.lt.s32.totalorder %s323_s23, %s323_s23 }
  0x18   :  { %90 = vrot.lane.b32.xlu1 %v388_v2, %s352_s20  ;;  %86 = vrot.lane.b32.xlu0 %v390_v3, %s352_s20  ;;  %vm96_vm1 = vcmp.lt.s32.totalorder %v416_v13, 1  ;;  %v436_v27 = vadd.s32 256, %v416_v13 }
  0x19   :  { %v443_v30 = vmul.u32.u64.low 2863311531, %v424_v18  ;;  %v444_v31 = vmul.u32.u64.high 2863311531, %v424_v18, %v443_v30  ;;  %v39_v48 = vshrl.u32 %v421_v17, 1  ;;  %p330_p11 = por %p329_p10, %p328_p9 }
  0x1a   :  { %v466_v55 = vmul.u32.u64.low 2863311531, %v436_v27  ;;  %v467_v56 = vmul.u32.u64.high 2863311531, %v436_v27, %v466_v55 }
  0x1b   :  { %p331_p12 = pnand %p330_p11, %p324_p8 }
  0x1c   :  { %94 = vrot.lane.b32.xlu1 %v396_v4, %s352_s20  ;;  %92 = vrot.lane.b32.xlu0 %v398_v5, %s352_s20 }
  0x20   :  { %105 = vrot.lane.b32.xlu1 %v390_v3, %s353_s0  ;;  %103 = vrot.lane.b32.xlu0 %v382_v1, %s353_s0 }
  0x24   :  { %109 = vrot.lane.b32.xlu1 %v388_v2, %s353_s0  ;;  %107 = vrot.lane.b32.xlu0 %v380_v0, %s353_s0 }
  0x28   :  { %113 = vrot.lane.b32.xlu1 %v396_v4, %s353_s0  ;;  %111 = vrot.lane.b32.xlu0 %v398_v5, %s353_s0 }
  0x86   :  { %v89_v6 = vpop.permute.xlu1 %88  ;;  %v85_v7 = vpop.permute.xlu0 %84 }
  0x87   :  { %v99_v28 = vsel %vm96_vm1, %v85_v7, %v89_v6 }
  0x8a   :  { %v91_v8 = vpop.permute.xlu1 %90  ;;  %v87_v9 = vpop.permute.xlu0 %86 }
  0x8b   :  { %v100_v29 = vsel %vm96_vm1, %v87_v9, %v91_v8 }
  0x8e   :  { %v95_v11 = vpop.permute.xlu1 %94  ;;  %v93_v12 = vpop.permute.xlu0 %92 }
  0x8f   :  { %v102_v21 = vsel %vm96_vm1, %v95_v11, %v87_v9  ;;  %v101_v22 = vsel %vm96_vm1, %v93_v12, %v85_v7  ;;  %v98_v32 = vsel %vm96_vm1, %v91_v8, %v95_v11  ;;  %v97_v33 = vsel %vm96_vm1, %v89_v6, %v93_v12 }
  0x90   :  { %v40_v7 = vmul.u32 3, %v39_v48  ;;  %v50_v8 = vshrl.u32 %v444_v31, 1  ;;  %v61_v11 = vshrl.u32 %v467_v56, 1 }
  0x92   :  { %v106_v14 = vpop.permute.xlu1 %105  ;;  %v104_v15 = vpop.permute.xlu0 %103  ;;  %v41_v9 = vsub.s32 %v416_v13, %v40_v7  ;;  %v51_v10 = vmul.u32 3, %v50_v8 }
  0x94   :  { %vm66_vm2 = vcmp.ne.s32.totalorder %v41_v9, 0  ;;  %vm69_vm3 = vcmp.lt.s32.totalorder %v41_v9, 0  ;;  %v52_v17 = vsub.s32 %v424_v18, %v51_v10 }
  0x95   :  { %vm473_vm4 = vmand %vm69_vm3, %vm66_vm2 }
  0x96   :  { %v110_v19 = vpop.permute.xlu1 %109  ;;  %v108_v20 = vpop.permute.xlu0 %107  ;;  %vm67_vm5 = vcmp.ne.s32.totalorder %v52_v17, 0  ;;  %vm70_vm6 = vcmp.lt.s32.totalorder %v52_v17, 0 }
  0x97   :  { %v119_v23 = vsel %vm115_vm0, %v106_v14, %v110_v19  ;;  %v118_v24 = vsel %vm115_vm0, %v104_v15, %v108_v20  ;;  %vm73_vm7 = vmand %vm70_vm6, %vm67_vm5 }
  0x98   :  { %v125_v25 = vadd.f32 %v119_v23, %v102_v21  ;;  %v122_v26 = vadd.f32 %v118_v24, %v101_v22  ;;  %v75_v21 = vadd.s32 3, %v41_v9 }
  0x9a   :  { %v131_v34 = vadd.f32 %v125_v25, %v390_v3  ;;  %v128_v35 = vadd.f32 %v122_v26, %v382_v1  ;;  %v114_v36 = vpop.permute.xlu1 %113  ;;  %v112_v37 = vpop.permute.xlu0 %111  ;;  %v78_v31 = vsel %vm473_vm4, %v75_v21, %v41_v9 }
  0x9b   :  { %v117_v38 = vsel %vm115_vm0, %v110_v19, %v114_v36  ;;  %v121_v39 = vsel %vm115_vm0, %v114_v36, %v106_v14  ;;  %v116_v40 = vsel %vm115_vm0, %v108_v20, %v112_v37  ;;  %v120_v41 = vsel %vm115_vm0, %v112_v37, %v104_v15 }
  0x9c   :  { %v262_v42 = vmul.f32 -0.33333334, %v131_v34  ;;  %v259_v43 = vmul.f32 -0.33333334, %v128_v35  ;;  %v126_v44 = vadd.f32 %v117_v38, %v100_v29  ;;  %v127_v45 = vadd.f32 %v121_v39, %v98_v32 }
  0x9d   :  { %v123_v46 = vadd.f32 %v116_v40, %v99_v28  ;;  %v124_v47 = vadd.f32 %v120_v41, %v97_v33  ;;  %v62_v19 = vmul.u32 3, %v61_v11  ;;  %v76_v32 = vadd.s32 3, %v52_v17 }
  0x9e   :  { %v152_v49 = vmul.f32 1.442695, %v262_v42  ;;  %v146_v50 = vmul.f32 1.442695, %v259_v43  ;;  %v132_v51 = vadd.f32 %v126_v44, %v388_v2  ;;  %v133_v52 = vadd.f32 %v127_v45, %v396_v4 }
  0x9f   :  { %v129_v53 = vadd.f32 %v123_v46, %v380_v0  ;;  %v130_v54 = vadd.f32 %v124_v47, %v398_v5  ;;  %v63_v28 = vsub.s32 %v436_v27, %v62_v19  ;;  %vm480_vm10 = vcmp.eq.s32.totalorder %v78_v31, 1 }
  0xa0   :  { %277 = vpow2.f32 %v152_v49  ;;  %v263_v57 = vmul.f32 -0.33333334, %v132_v51  ;;  %v264_v58 = vmul.f32 -0.33333334, %v133_v52  ;;  %v79_v34 = vsel %vm73_vm7, %v76_v32, %v52_v17 }
  0xa1   :  { %279 = vpow2.f32 %v146_v50  ;;  %v260_v59 = vmul.f32 -0.33333334, %v129_v53  ;;  %v261_v60 = vmul.f32 -0.33333334, %v130_v54  ;;  %vm68_vm8 = vcmp.ne.s32.totalorder %v63_v28, 0 }
  0xa2   :  { %v154_v61 = vmul.f32 1.442695, %v263_v57  ;;  %v156_v62 = vmul.f32 1.442695, %v264_v58  ;;  %vm71_vm9 = vcmp.lt.s32.totalorder %v63_v28, 0  ;;  %v77_v27 = vadd.s32 3, %v63_v28 }
  0xa3   :  { %v148_v63 = vmul.f32 1.442695, %v260_v59  ;;  %v150_v6 = vmul.f32 1.442695, %v261_v60  ;;  %vm74_vm11 = vmand %vm71_vm9, %vm68_vm8  ;;  %vm489_vm12 = vcmp.eq.s32.totalorder %v79_v34, 1 }
  0xa4   :  { %281 = vpow2.f32 %v154_v61  ;;  %v80_v40 = vsel %vm74_vm11, %v77_v27, %v63_v28 }
  0xa5   :  { %283 = vpow2.f32 %v156_v62  ;;  %vm499_vm13 = vcmp.eq.s32.totalorder %v80_v40, 1 }
  0xa6   :  { %285 = vpow2.f32 %v148_v63 }
  0xa7   :  { %287 = vpow2.f32 %v150_v6 }
  0xaa   :  { %v278_v12 = vpop.eup %277 }
  0xab   :  { %v280_v14 = vpop.eup %279  ;;  %v161_v15 = vadd.f32 1.0, %v278_v12 }
  0xac   :  { %v158_v16 = vadd.f32 1.0, %v280_v14 }
  0xad   :  { %289 = vrcp.f32 %v161_v15 }
  0xae   :  { %v282_v20 = vpop.eup %281  ;;  %291 = vrcp.f32 %v158_v16 }
  0xaf   :  { %v284_v22 = vpop.eup %283  ;;  %v162_v23 = vadd.f32 1.0, %v282_v20 }
  0xb0   :  { %v286_v25 = vpop.eup %285  ;;  %v163_v26 = vadd.f32 1.0, %v284_v22 }
  0xb1   :  { %v288_v29 = vpop.eup %287  ;;  %293 = vrcp.f32 %v162_v23  ;;  %v159_v18 = vadd.f32 1.0, %v286_v25 }
  0xb2   :  { %295 = vrcp.f32 %v163_v26  ;;  %v160_v30 = vadd.f32 1.0, %v288_v29 }
  0xb3   :  { %297 = vrcp.f32 %v159_v18 }
  0xb4   :  { %299 = vrcp.f32 %v160_v30 }
  0xb7   :  { %v290_v35 = vpop.eup %289 }
  0xb8   :  { %v292_v36 = vpop.eup %291  ;;  %v179_v37 = vsel %vm480_vm10, %v290_v35, 0.0 }
  0xb9   :  { %184 = vrot.lane.b32.xlu1 %v179_v37, %s352_s20  ;;  %v176_v38 = vsel %vm480_vm10, %v292_v36, 0.0 }
  0xba   :  { %182 = vrot.lane.b32.xlu0 %v176_v38, %s352_s20 }
  0xbb   :  { %v294_v41 = vpop.eup %293 }
  0xbc   :  { %v296_v42 = vpop.eup %295  ;;  %v180_v43 = vsel %vm489_vm12, %v294_v41, 0.0 }
  0xbd   :  { %v496_v44 = vpop.eup %297  ;;  %188 = vrot.lane.b32.xlu1 %v180_v43, %s352_s20  ;;  %v181_v48 = vsel %vm499_vm13, %v296_v42, 0.0 }
  0xbe   :  { %v177_v46 = vsel %vm489_vm12, %v496_v44, 0.0  ;;  %v300_v47 = vpop.eup %299 }
  0xbf   :  { %186 = vrot.lane.b32.xlu0 %v177_v46, %s352_s20  ;;  %v178_v49 = vsel %vm499_vm13, %v300_v47, 0.0 }
  0xc1   :  { %192 = vrot.lane.b32.xlu1 %v181_v48, %s352_s20 }
  0xc3   :  { %190 = vrot.lane.b32.xlu0 %v178_v49, %s352_s20 }
  0xc5   :  { %202 = vrot.lane.b32.xlu1 %v179_v37, %s353_s0 }
  0xc7   :  { %200 = vrot.lane.b32.xlu0 %v176_v38, %s353_s0 }
  0xc9   :  { %206 = vrot.lane.b32.xlu1 %v180_v43, %s353_s0 }
  0xcb   :  { %204 = vrot.lane.b32.xlu0 %v177_v46, %s353_s0 }
  0xcd   :  { %210 = vrot.lane.b32.xlu1 %v181_v48, %s353_s0 }
  0xcf   :  { %208 = vrot.lane.b32.xlu0 %v178_v49, %s353_s0 }
 0x12b   :  { %v185_v50 = vpop.permute.xlu1 %184 }
 0x12c   :  { %v183_v51 = vpop.permute.xlu0 %182 }
 0x12f   :  { %v189_v52 = vpop.permute.xlu1 %188 }
 0x130   :  { %v197_v7 = vsel %vm96_vm1, %v185_v50, %v189_v52 }
 0x131   :  { %v187_v53 = vpop.permute.xlu0 %186 }
 0x132   :  { %v196_v16 = vsel %vm96_vm1, %v183_v51, %v187_v53 }
 0x133   :  { %v193_v54 = vpop.permute.xlu1 %192 }
 0x134   :  { %v199_v59 = vsel %vm96_vm1, %v193_v54, %v185_v50  ;;  %v195_v11 = vsel %vm96_vm1, %v189_v52, %v193_v54 }
 0x135   :  { %v191_v55 = vpop.permute.xlu0 %190 }
 0x136   :  { %v198_v63 = vsel %vm96_vm1, %v191_v55, %v183_v51  ;;  %v194_v22 = vsel %vm96_vm1, %v187_v53, %v191_v55 }
 0x137   :  { %v203_v56 = vpop.permute.xlu1 %202 }
 0x139   :  { %v201_v57 = vpop.permute.xlu0 %200 }
 0x13b   :  { %v207_v58 = vpop.permute.xlu1 %206 }
 0x13c   :  { %v215_v60 = vsel %vm115_vm0, %v203_v56, %v207_v58 }
 0x13d   :  { %v221_v61 = vadd.f32 %v215_v60, %v199_v59  ;;  %v205_v62 = vpop.permute.xlu0 %204 }
 0x13e   :  { %v214_v6 = vsel %vm115_vm0, %v201_v57, %v205_v62 }
 0x13f   :  { %v227_v8 = vsel %vm480_vm10, %v290_v35, %v221_v61  ;;  %v218_v9 = vadd.f32 %v214_v6, %v198_v63  ;;  %v211_v10 = vpop.permute.xlu1 %210 }
 0x140   :  { %v233_v12 = vmul.f32 %v227_v8, %v390_v3  ;;  %v213_v14 = vsel %vm115_vm0, %v207_v58, %v211_v10  ;;  %v217_v15 = vsel %vm115_vm0, %v211_v10, %v203_v56 }
 0x141   :  { %v224_v17 = vsel %vm480_vm10, %v292_v36, %v218_v9  ;;  %v222_v19 = vadd.f32 %v213_v14, %v197_v7  ;;  %v223_v20 = vadd.f32 %v217_v15, %v195_v11  ;;  %v209_v21 = vpop.permute.xlu0 %208 }
 0x142   :  { %239 = vst [vmem:[#allocation5 + $0x18] sm:$0xff] %v233_v12  ;;  %v230_v3 = vmul.f32 %v224_v17, %v382_v1  ;;  %v212_v23 = vsel %vm115_vm0, %v205_v62, %v209_v21  ;;  %v216_v24 = vsel %vm115_vm0, %v209_v21, %v201_v57 }
 0x143   :  { %v228_v25 = vsel %vm489_vm12, %v294_v41, %v222_v19  ;;  %v229_v26 = vsel %vm499_vm13, %v296_v42, %v223_v20  ;;  %v219_v28 = vadd.f32 %v212_v23, %v196_v16  ;;  %v220_v29 = vadd.f32 %v216_v24, %v194_v22 }
 0x144   :  { %236 = vst [vmem:[#allocation5] sm:$0xff] %v230_v3  ;;  %v234_v18 = vmul.f32 %v228_v25, %v388_v2  ;;  %v235_v1 = vmul.f32 %v229_v26, %v396_v4 }
 0x145   :  { %v225_v13 = vsel %vm489_vm12, %v496_v44, %v219_v28  ;;  %v226_v30 = vsel %vm499_vm13, %v300_v47, %v220_v29 }
 0x146   :  { %240 = vst [vmem:[#allocation5 + $0x20] sm:$0xff] %v234_v18  ;;  %241 = vst [vmem:[#allocation5 + $0x28] sm:$0xff] %v235_v1  ;;  %v231_v31 = vmul.f32 %v225_v13, %v380_v0  ;;  %v232_v32 = vmul.f32 %v226_v30, %v398_v5 }
 0x148   :  { %237 = vst [vmem:[#allocation5 + $0x8] sm:$0xff] %v231_v31  ;;  %238 = vst [vmem:[#allocation5 + $0x10] sm:$0xff] %v232_v32 }
 0x149   :  { %334 = shalt.err (!%p331_p12)
}
 0x14a   :  { %s335_s26 = scalar_lea.hbm %s578_s1, 768 }
 0x14b   :  { %p336_p13 = scmp.ne.s32.totalorder %s578_s1, %s335_s26  ;;  %p339_p0 = scmp.lt.u32.totalorder %s335_s26, %s578_s1 }
 0x14d   :  { %p341_p1 = pnand %p339_p0, %p336_p13 }
 0x14f   :  { %344 = shalt.err (!%p341_p1)
}
 0x150   :  { %253 = dma.vmem_to_hbm [thread:$0]  %s248_s22, 768, %s578_s1, [#allocation4], %s350_s16, %s350_s16, %s351_s17  }
 0x151   :  { %347 = dma.done.wait [#allocation4], 768  }
 0x152   :  { %348 = vsyncadd [#allocation4], 4294966528 }
 0x153   :  { %257 = vsyncpa [#allocation3], 1 }
 0x154   :  { %258 = vsyncpa [#allocation4], 1 }

</bundles_post_ra>
